<compile_context>
chip_gen: v6e
topology: v6e:2x2x1
jax: 0.10.0
libtpu: 0.0.40
codegen_flags: <defaults>
</compile_context>

<pallas_src>
import functools

import jax
import jax.numpy as jnp
from jax import lax
from jax.experimental import pallas as pl
from jax.experimental.pallas import tpu as pltpu


LANE = 128   # TPU lane width (last dim)
SUB = 8      # TPU sublane height (second-to-last dim)
NEG = -1e30  # "minus infinity" for padded logit lanes


def _round_up(n, m):
    return ((n + m - 1) // m) * m


def _pad_to(arr, shape, value=0.0):
    pads = [(0, s - d) for d, s in zip(arr.shape, shape)]
    return jnp.pad(arr, pads, constant_values=value)


# ---------------------------------------------------------------------------
# Pass 1: input projection, fully parallel over timestep blocks.
# ---------------------------------------------------------------------------
def _input_proj_kernel(x_ref, wih_ref, b1_ref, p_ref):
    # P = x @ W_ih + b1, batched over T_BLK * B_P rows (MXU-friendly M).
    p_ref[...] = (
        jnp.dot(x_ref[...], wih_ref[...], preferred_element_type=jnp.float32)
        + b1_ref[...]
    )


# ---------------------------------------------------------------------------
# Pass 2: the recurrence. One grid step == T_BLK timesteps (unrolled).
# Hidden state is carried across grid steps in the resident `carry_ref`
# output block (written back to HBM once, at grid end).
# ---------------------------------------------------------------------------
def _recurrence_kernel(p_ref, h0_ref, whh_ref, h_out_ref, carry_ref,
                       *, t_blk, b_p, matmul_dtype):
    blk = pl.program_id(0)

    @pl.when(blk == 0)
    def _():
        carry_ref[...] = h0_ref[...]

    def step(i, h):
        row = pl.multiple_of(i * b_p, b_p)
        h_new = p_ref[pl.ds(row, b_p), :] + jnp.dot(
            h.astype(matmul_dtype), whh_ref[...],
            preferred_element_type=jnp.float32)
        h_out_ref[pl.ds(row, b_p), :] = h_new
        return h_new

    # Unrolled so the scheduler can overlap work around the serial h @ W_hh.
    carry_ref[...] = lax.fori_loop(0, t_blk, step, carry_ref[...], unroll=True)


# ---------------------------------------------------------------------------
# Pass 3: output projection + log-softmax, fully parallel over timestep blocks.
# ---------------------------------------------------------------------------
def _output_kernel(h_ref, w2_ref, b2_ref, out_ref, *, matmul_dtype):
    logits = (
        jnp.dot(h_ref[...].astype(matmul_dtype), w2_ref[...],
                preferred_element_type=jnp.float32)
        + b2_ref[...]
    )
    # Pad lanes of b2 are -1e30 -> exp underflows to 0, so max/sum over the
    # full 128-lane row is still correct.
    m = jnp.max(logits, axis=-1, keepdims=True)
    shifted = logits - m
    lse = jnp.log(jnp.sum(jnp.exp(shifted), axis=-1, keepdims=True))
    out_ref[...] = shifted - lse


# ---------------------------------------------------------------------------
# Host-side wrapper.
# ---------------------------------------------------------------------------
def rnn_forward_sequence(xs, h0, params, *, matmul_dtype=jnp.bfloat16, t_blk=8):
    """Run the RNN cell over a whole sequence.

    xs: (T, B, input_size)   h0: (B, hidden_size)
    Returns (log-probs (T, B, output_size), final hidden (B, hidden_size)).
    Each time step applies exactly the PyTorch module's forward.
    """
    w1, b1, w2, b2 = params
    T, B, IN = xs.shape
    HID = w1.shape[1]
    OUT = w2.shape[1]

    IN_P = _round_up(IN, LANE)
    HID_P = _round_up(HID, LANE)
    OUT_P = _round_up(OUT, LANE)
    B_P = _round_up(B, SUB)
    T_BLK = min(t_blk, T)
    T_P = _round_up(T, T_BLK)
    n_blk = T_P // T_BLK
    ROWS = T_P * B_P
    R_BLK = T_BLK * B_P

    f32 = jnp.float32

    # Split the i2h weight (rows 0..IN -> input part, IN.. -> hidden part),
    # zero-pad to lane/sublane-friendly shapes, cast matmul operands once.
    w_ih_p = _pad_to(w1[:IN], (IN_P, HID_P)).astype(matmul_dtype)
    w_hh_p = _pad_to(w1[IN:], (HID_P, HID_P)).astype(matmul_dtype)
    w2_p = _pad_to(w2, (HID_P, OUT_P)).astype(matmul_dtype)
    b1_p = _pad_to(b1.astype(f32)[None, :], (1, HID_P))
    b2_p = jnp.full((1, OUT_P), NEG, f32).at[0, :OUT].set(b2.astype(f32))

    xs_flat = _pad_to(xs.astype(f32), (T_P, B_P, IN_P)
                      ).astype(matmul_dtype).reshape(ROWS, IN_P)
    h0_p = _pad_to(h0.astype(f32), (B_P, HID_P))

    parallel = pltpu.CompilerParams(dimension_semantics=("parallel",))
    serial = pltpu.CompilerParams(dimension_semantics=("arbitrary",))

    # ---- Pass 1: P = x @ W_ih + b1 (parallel over T blocks) ----------------
    p_flat = pl.pallas_call(
        _input_proj_kernel,
        out_shape=jax.ShapeDtypeStruct((ROWS, HID_P), f32),
        grid_spec=pltpu.PrefetchScalarGridSpec(
            num_scalar_prefetch=0,
            grid=(n_blk,),
            in_specs=[
                pl.BlockSpec((R_BLK, IN_P), lambda i: (i, 0)),     # x stream
                pl.BlockSpec((IN_P, HID_P), lambda i: (0, 0)),     # W_ih resident
                pl.BlockSpec((1, HID_P), lambda i: (0, 0)),        # b1 resident
            ],
            out_specs=pl.BlockSpec((R_BLK, HID_P), lambda i: (i, 0)),
        ),
        compiler_params=parallel,
    )(xs_flat, w_ih_p, b1_p)

    # ---- Pass 2: recurrence h_t = P_t + h_{t-1} @ W_hh (serial over T) -----
    rec_kernel = functools.partial(
        _recurrence_kernel, t_blk=T_BLK, b_p=B_P, matmul_dtype=matmul_dtype)
    h_flat, _carry = pl.pallas_call(
        rec_kernel,
        out_shape=(
            jax.ShapeDtypeStruct((ROWS, HID_P), f32),
            jax.ShapeDtypeStruct((B_P, HID_P), f32),
        ),
        grid_spec=pltpu.PrefetchScalarGridSpec(
            num_scalar_prefetch=0,
            grid=(n_blk,),
            in_specs=[
                pl.BlockSpec((R_BLK, HID_P), lambda i: (i, 0)),    # P stream
                pl.BlockSpec((B_P, HID_P), lambda i: (0, 0)),      # h0 (read @ blk 0)
                pl.BlockSpec((HID_P, HID_P), lambda i: (0, 0)),    # W_hh resident
            ],
            out_specs=[
                pl.BlockSpec((R_BLK, HID_P), lambda i: (i, 0)),    # h_t stream
                pl.BlockSpec((B_P, HID_P), lambda i: (0, 0)),      # resident carry
            ],
        ),
        compiler_params=serial,
    )(p_flat, h0_p, w_hh_p)

    # ---- Pass 3: h2o + log-softmax (parallel over T blocks) ----------------
    out_kernel = functools.partial(_output_kernel, matmul_dtype=matmul_dtype)
    lp_flat = pl.pallas_call(
        out_kernel,
        out_shape=jax.ShapeDtypeStruct((ROWS, OUT_P), f32),
        grid_spec=pltpu.PrefetchScalarGridSpec(
            num_scalar_prefetch=0,
            grid=(n_blk,),
            in_specs=[
                pl.BlockSpec((R_BLK, HID_P), lambda i: (i, 0)),    # h stream
                pl.BlockSpec((HID_P, OUT_P), lambda i: (0, 0)),    # W2 resident
                pl.BlockSpec((1, OUT_P), lambda i: (0, 0)),        # b2 resident
            ],
            out_specs=pl.BlockSpec((R_BLK, OUT_P), lambda i: (i, 0)),
        ),
        compiler_params=parallel,
    )(h_flat, w2_p, b2_p)

    lp = lp_flat.reshape(T_P, B_P, OUT_P)[:T, :B, :OUT]
    h_fin = h_flat.reshape(T_P, B_P, HID_P)[T - 1, :B, :HID]
    return lp, h_fin


def rnn_forward(x, hidden, params, **kw):
    """Exact module signature: x (input_size,), hidden (1, hidden_size).
    Returns 1-D (output, hidden) like the PyTorch forward."""
    out_seq, h_fin = rnn_forward_sequence(x[None, None, :], hidden, params, **kw)
    return out_seq[0, 0], h_fin[0]


def rnn_reference(xs, h0, params):
    """Pure-JAX reference implementing the module forward at each step."""
    w1, b1, w2, b2 = params
    hi = jax.lax.Precision.HIGHEST

    def step(h, x_t):
        comb = jnp.concatenate([x_t, h], axis=-1)
        h_new = jnp.dot(comb, w1, precision=hi) + b1
        logits = jnp.dot(h_new, w2, precision=hi) + b2
        return h_new, jax.nn.log_softmax(logits, axis=-1)

    h_fin, outs = jax.lax.scan(step, h0, xs)
    return outs, h_fin


def init_params(key, input_size, hidden_size, output_size):
    """Deterministic init mimicking nn.Linear's U(-1/sqrt(fan_in), 1/sqrt(fan_in))."""
    k1, k2, k3, k4 = jax.random.split(key, 4)
    fan1 = input_size + hidden_size
    bound1 = 1.0 / float(fan1) ** 0.5
    w1 = jax.random.uniform(k1, (fan1, hidden_size), jnp.float32, -bound1, bound1)
    b1 = jax.random.uniform(k2, (hidden_size,), jnp.float32, -bound1, bound1)
    bound2 = 1.0 / float(hidden_size) ** 0.5
    w2 = jax.random.uniform(k3, (hidden_size, output_size), jnp.float32, -bound2, bound2)
    b2 = jax.random.uniform(k4, (output_size,), jnp.float32, -bound2, bound2)
    return w1, b1, w2, b2


if __name__ == "__main__":
    input_size, hidden_size, output_size = 16, 32, 8
    T, B = 8, 8

    key = jax.random.PRNGKey(0)
    kx, kp = jax.random.split(key, 2)

    xs = jax.random.normal(kx, (T, B, input_size), jnp.float32)
    h0 = jnp.zeros((B, hidden_size), jnp.float32)      # init_hidden() per batch row
    params = init_params(kp, input_size, hidden_size, output_size)

    ref_out, ref_h = rnn_reference(xs, h0, params)

    # Exact (f32 matmul operands) path.
    out_f32, h_f32 = rnn_forward_sequence(xs, h0, params, matmul_dtype=jnp.float32)
    jax.block_until_ready((out_f32, h_f32))
    assert out_f32.shape == (T, B, output_size)
    assert h_f32.shape == (B, hidden_size)
    assert jnp.allclose(out_f32, ref_out, atol=1e-2, rtol=1e-2)
    assert jnp.allclose(h_f32, ref_h, atol=1e-2, rtol=1e-2)

    # Default bf16-operand path (what you'd run on v6e/v7x); accumulation and
    # softmax math stay f32 inside the kernels.
    out_bf, h_bf = rnn_forward_sequence(xs, h0, params)
    jax.block_until_ready((out_bf, h_bf))
    assert out_bf.shape == (T, B, output_size)
    assert h_bf.shape == (B, hidden_size)
    assert jnp.allclose(out_bf, ref_out, atol=6e-2, rtol=6e-2)
    assert jnp.allclose(h_bf, ref_h, atol=6e-2, rtol=6e-2)

    # log-softmax sanity: probabilities sum to 1 at every step.
    assert jnp.allclose(jnp.sum(jnp.exp(out_bf), axis=-1), 1.0, atol=2e-3)

    # Single-step call with the original module's signature.
    out1, hid1 = rnn_forward(xs[0, 0], jnp.zeros((1, hidden_size), jnp.float32), params)
    jax.block_until_ready((out1, hid1))
    assert out1.shape == (output_size,)
    assert hid1.shape == (hidden_size,)
    assert abs(float(jnp.sum(jnp.exp(out1))) - 1.0) < 2e-3

    print("KERNEL_OK")
</pallas_src>

<mosaic_0001>
module attributes {stable_mosaic.version = 11 : i64} {
  func.func @_input_proj_kernel(%arg0: i32, %arg1: memref<64x128xf32, #tpu.memory_space<vmem>>, %arg2: memref<128x128xf32, #tpu.memory_space<vmem>>, %arg3: memref<1x128xf32, #tpu.memory_space<vmem>>, %arg4: memref<64x128xf32, #tpu.memory_space<vmem>>) attributes {dimension_semantics = [#tpu.dimension_semantics<parallel>], iteration_bounds = array<i64: 1>, scalar_prefetch = 0 : i64, scratch_operands = 0 : i64, tpu.core_type = #tpu.core_type<tc>, window_params = [{transform_indices = @transform_0, window_bounds = array<i64: 64, 128>}, {pipeline_mode = #tpu.pipeline_mode<synchronous>, transform_indices = @transform_1, window_bounds = array<i64: 128, 128>}, {pipeline_mode = #tpu.pipeline_mode<synchronous>, transform_indices = @transform_2, window_bounds = array<i64: 1, 128>}, {transform_indices = @transform_3, window_bounds = array<i64: 64, 128>}]} {
    %c0 = arith.constant 0 : index
    %c0_0 = arith.constant 0 : index
    %0 = vector.load %arg1[%c0, %c0_0] : memref<64x128xf32, #tpu.memory_space<vmem>>, vector<64x128xf32>
    %c0_1 = arith.constant 0 : index
    %c0_2 = arith.constant 0 : index
    %1 = vector.load %arg2[%c0_1, %c0_2] : memref<128x128xf32, #tpu.memory_space<vmem>>, vector<128x128xf32>
    %cst = arith.constant dense<0.000000e+00> : vector<64x128xf32>
    %2 = tpu.matmul %0, %1, %cst {dimension_numbers = #tpu.dot_dimension_numbers<[1], [0], [0], [1], [0, 0, 1, 1], [], []>} : vector<64x128xf32>, vector<128x128xf32>, vector<64x128xf32> -> vector<64x128xf32>
    %c0_3 = arith.constant 0 : index
    %c0_4 = arith.constant 0 : index
    %3 = vector.load %arg3[%c0_3, %c0_4] : memref<1x128xf32, #tpu.memory_space<vmem>>, vector<1x128xf32>
    %4 = vector.broadcast %3 : vector<1x128xf32> to vector<64x128xf32>
    %5 = arith.addf %2, %4 : vector<64x128xf32>
    %c0_5 = arith.constant 0 : index
    %c0_6 = arith.constant 0 : index
    %6 = vector.load %arg4[%c0_5, %c0_6] : memref<64x128xf32, #tpu.memory_space<vmem>>, vector<64x128xf32>
    tpu.vector_store %arg4[%c0_5, %c0_6], %5 {strides = array<i32>} : memref<64x128xf32, #tpu.memory_space<vmem>>, vector<64x128xf32>,
    return
  }
  func.func @transform_0(%arg0: i32) -> (i32, i32) {
    %c0_i32 = arith.constant 0 : i32
    %c0_i32_0 = arith.constant 0 : i32
    return %arg0, %c0_i32 : i32, i32
  }
  func.func @transform_1(%arg0: i32) -> (i32, i32) {
    %c0_i32 = arith.constant 0 : i32
    %c0_i32_0 = arith.constant 0 : i32
    %c0_i32_1 = arith.constant 0 : i32
    return %c0_i32, %c0_i32_0 : i32, i32
  }
  func.func @transform_2(%arg0: i32) -> (i32, i32) {
    %c0_i32 = arith.constant 0 : i32
    %c0_i32_0 = arith.constant 0 : i32
    %c0_i32_1 = arith.constant 0 : i32
    return %c0_i32, %c0_i32_0 : i32, i32
  }
  func.func @transform_3(%arg0: i32) -> (i32, i32) {
    %c0_i32 = arith.constant 0 : i32
    %c0_i32_0 = arith.constant 0 : i32
    return %arg0, %c0_i32 : i32, i32
  }
}

</mosaic_0001>

<bundles_post_ra>
// kernel: tpu_custom_call.1
= control target key start
LH: loop header
LB: loop body
LE: loop exit
PB: predicated region body
PF: predicated region fallthrough
CT: control target
= control target key end

     0   :  { %8 = vsyncpa [#allocation3], 0  ;;  %s423_s0 = inlined_call_operand.hbm [shape: f32[64,128], index: 0, kind: input, shape index: {}]   ;;  %s424_s1 = inlined_call_operand.hbm [shape: f32[128,128], index: 1, kind: input, shape index: {}]   ;;  %s425_s2 = inlined_call_operand.vmem [shape: f32[1,128], index: 2, kind: input, shape index: {}]   ;;  %s426_s3 = inlined_call_operand.hbm [shape: f32[64,128], index: 3, kind: output, shape index: {}]  }
   0x1   :  { %9 = vsyncpa [#allocation6], 0 }
   0x2   :  { %10 = vsyncpa [#allocation4], 0  ;;  %s377_s12 = smov [#allocation2]  }
   0x3   :  { %s16_s13 = sshll.u32 %s377_s12, 4  ;;  %s17_s13 = int_to_ptr.vmem [resolvable:$true] %s16_s13 }
   0x4   :  { %s319_s14 = scalar_lea.vmem %s17_s13, 1024  ;;  %p324_p1 = scmp.lt.s32.totalorder %s17_s13, %s17_s13 }
   0x5   :  { %p320_p0 = scmp.ne.s32.totalorder %s17_s13, %s319_s14  ;;  %p325_p2 = scmp.lt.s32.totalorder %s319_s14, %s319_s14 }
   0x7   :  { %p326_p3 = por %p325_p2, %p324_p1 }
   0x9   :  { %p327_p4 = pnand %p326_p3, %p320_p0 }
   0xb   :  { %330 = shalt.err (!%p327_p4)
}
   0xc   :  { %s378_s15 = smov 128   ;;  %s379_s16 = smov 8  }
   0xd   :  { %22 = dma.hbm_to_vmem [thread:$0]  %s423_s0, 1024, %s17_s13, [#allocation3], %s378_s15, %s378_s15, %s379_s16  }
   0xe   :  { %s380_s19 = smov [#allocation5]  }
   0xf   :  { %s28_s20 = sshll.u32 %s380_s19, 4  ;;  %s29_s20 = int_to_ptr.vmem [resolvable:$true] %s28_s20 }
  0x10   :  { %s339_s21 = scalar_lea.vmem %s29_s20, 2048  ;;  %p344_p6 = scmp.lt.s32.totalorder %s29_s20, %s29_s20 }
  0x11   :  { %p340_p5 = scmp.ne.s32.totalorder %s29_s20, %s339_s21  ;;  %p345_p7 = scmp.lt.s32.totalorder %s339_s21, %s339_s21 }
  0x13   :  { %p346_p8 = por %p345_p7, %p344_p6 }
  0x15   :  { %p347_p9 = pnand %p346_p8, %p340_p5 }
  0x17   :  { %350 = shalt.err (!%p347_p9)
}
  0x18   :  { %34 = dma.hbm_to_vmem [thread:$0]  %s424_s1, 2048, %s29_s20, [#allocation6], %s378_s15, %s378_s15, %s379_s16  }
  0x19   :  { %371 = dma.done.wait [#allocation3], 1024  }
  0x1a   :  { %372 = vsyncadd [#allocation3], 4294966272 }
  0x1b   :  { %373 = dma.done.wait [#allocation6], 2048  }
  0x1c   :  { %374 = vsyncadd [#allocation6], 4294965248  ;;  %v66_v0 = vld [vmem:[#allocation5 + $0x78] sm:$0xff]  ;;  %v65_v1 = vld [vmem:[#allocation5 + $0x70] sm:$0xff]  ;;  %s381_s24 = smov [#allocation7]  }
  0x1d   :  { %230 = vmatprep.subr.mxu0 %v66_v0  ;;  %274 = vmatprep.subr.mxu1 %v66_v0  ;;  %v64_v2 = vld [vmem:[#allocation5 + $0x68] sm:$0xff]  ;;  %v63_v3 = vld [vmem:[#allocation5 + $0x60] sm:$0xff]  ;;  %v62_v4 = vld [vmem:[#allocation5 + $0x58] sm:$0xff]  ;;  %s192_s25 = sshll.u32 %s381_s24, 4  ;;  %s193_s25 = int_to_ptr.vmem [resolvable:$true] %s192_s25 }
  0x1e   :  { %231 = vmatpush3.msra.mxu0 %v66_v0  ;;  %290 = vmatpush3.msra.mxu1 %v66_v0  ;;  %v61_v5 = vld [vmem:[#allocation5 + $0x50] sm:$0xff]  ;;  %v60_v6 = vld [vmem:[#allocation5 + $0x48] sm:$0xff]  ;;  %v59_v7 = vld [vmem:[#allocation5 + $0x40] sm:$0xff]  ;;  %p356_p11 = scmp.lt.s32.totalorder %s193_s25, %s193_s25 }
  0x1f   :  { %232 = vmatprep.subr.mxu0 %v65_v1  ;;  %275 = vmatprep.subr.mxu1 %v65_v1  ;;  %v58_v8 = vld [vmem:[#allocation5 + $0x38] sm:$0xff]  ;;  %v57_v9 = vld [vmem:[#allocation5 + $0x30] sm:$0xff]  ;;  %v56_v10 = vld [vmem:[#allocation5 + $0x28] sm:$0xff] }
  0x20   :  { %233 = vmatpush3.msra.mxu0 %v65_v1  ;;  %291 = vmatpush3.msra.mxu1 %v65_v1  ;;  %v55_v11 = vld [vmem:[#allocation5 + $0x20] sm:$0xff]  ;;  %v54_v12 = vld [vmem:[#allocation5 + $0x18] sm:$0xff]  ;;  %v53_v13 = vld [vmem:[#allocation5 + $0x10] sm:$0xff] }
  0x21   :  { %234 = vmatprep.subr.mxu0 %v64_v2  ;;  %276 = vmatprep.subr.mxu1 %v64_v2  ;;  %v52_v14 = vld [vmem:[#allocation5 + $0x8] sm:$0xff]  ;;  %v51_v15 = vld [vmem:[#allocation5] sm:$0xff]  ;;  %v45_v20 = vld [vmem:[#allocation2 + $0x10] sm:$0xff] }
  0x22   :  { %235 = vmatpush3.msra.mxu0 %v64_v2  ;;  %292 = vmatpush3.msra.mxu1 %v64_v2  ;;  %v43_v16 = vld [vmem:[#allocation2] sm:$0xff]  ;;  %v44_v18 = vld [vmem:[#allocation2 + $0x8] sm:$0xff]  ;;  %v49_v21 = vld [vmem:[#allocation2 + $0x30] sm:$0xff] }
  0x23   :  { %236 = vmatprep.subr.mxu0 %v63_v3  ;;  %277 = vmatprep.subr.mxu1 %v63_v3  ;;  %v47_v17 = vld [vmem:[#allocation2 + $0x20] sm:$0xff]  ;;  %v48_v19 = vld [vmem:[#allocation2 + $0x28] sm:$0xff]  ;;  %v46_v22 = vld [vmem:[#allocation2 + $0x18] sm:$0xff] }
  0x24   :  { %237 = vmatpush3.msra.mxu0 %v63_v3  ;;  %293 = vmatpush3.msra.mxu1 %v63_v3  ;;  %v50_v23 = vld [vmem:[#allocation2 + $0x38] sm:$0xff]  ;;  %v205_v24 = vld [vmem:[%s425_s2] ss:$0 sm:$0xff]  ;;  %s351_s2 = scalar_lea.vmem %s193_s25, 1024 }
  0x25   :  { %238 = vmatprep.subr.mxu0 %v62_v4  ;;  %278 = vmatprep.subr.mxu1 %v62_v4  ;;  %p352_p10 = scmp.ne.s32.totalorder %s193_s25, %s351_s2  ;;  %p357_p12 = scmp.lt.s32.totalorder %s351_s2, %s351_s2 }
  0x26   :  { %239 = vmatpush3.msra.mxu0 %v62_v4  ;;  %294 = vmatpush3.msra.mxu1 %v62_v4 }
  0x27   :  { %240 = vmatprep.subr.mxu0 %v61_v5  ;;  %279 = vmatprep.subr.mxu1 %v61_v5  ;;  %p358_p13 = por %p357_p12, %p356_p11 }
  0x28   :  { %241 = vmatpush3.msra.mxu0 %v61_v5  ;;  %295 = vmatpush3.msra.mxu1 %v61_v5 }
  0x29   :  { %242 = vmatprep.subr.mxu0 %v60_v6  ;;  %280 = vmatprep.subr.mxu1 %v60_v6  ;;  %p359_p0 = pnand %p358_p13, %p352_p10 }
  0x2a   :  { %243 = vmatpush3.msra.mxu0 %v60_v6  ;;  %296 = vmatpush3.msra.mxu1 %v60_v6 }
  0x2b   :  { %244 = vmatprep.subr.mxu0 %v59_v7  ;;  %281 = vmatprep.subr.mxu1 %v59_v7 }
  0x2c   :  { %245 = vmatpush3.msra.mxu0 %v59_v7  ;;  %297 = vmatpush3.msra.mxu1 %v59_v7 }
  0x2d   :  { %246 = vmatprep.subr.mxu0 %v58_v8  ;;  %282 = vmatprep.subr.mxu1 %v58_v8 }
  0x2e   :  { %247 = vmatpush3.msra.mxu0 %v58_v8  ;;  %298 = vmatpush3.msra.mxu1 %v58_v8 }
  0x2f   :  { %248 = vmatprep.subr.mxu0 %v57_v9  ;;  %283 = vmatprep.subr.mxu1 %v57_v9 }
  0x30   :  { %249 = vmatpush3.msra.mxu0 %v57_v9  ;;  %299 = vmatpush3.msra.mxu1 %v57_v9 }
  0x31   :  { %250 = vmatprep.subr.mxu0 %v56_v10  ;;  %284 = vmatprep.subr.mxu1 %v56_v10 }
  0x32   :  { %251 = vmatpush3.msra.mxu0 %v56_v10  ;;  %300 = vmatpush3.msra.mxu1 %v56_v10 }
  0x33   :  { %252 = vmatprep.subr.mxu0 %v55_v11  ;;  %285 = vmatprep.subr.mxu1 %v55_v11 }
  0x34   :  { %253 = vmatpush3.msra.mxu0 %v55_v11  ;;  %301 = vmatpush3.msra.mxu1 %v55_v11 }
  0x35   :  { %254 = vmatprep.subr.mxu0 %v54_v12  ;;  %286 = vmatprep.subr.mxu1 %v54_v12 }
  0x36   :  { %255 = vmatpush3.msra.mxu0 %v54_v12  ;;  %302 = vmatpush3.msra.mxu1 %v54_v12 }
  0x37   :  { %256 = vmatprep.subr.mxu0 %v53_v13  ;;  %287 = vmatprep.subr.mxu1 %v53_v13 }
  0x38   :  { %257 = vmatpush3.msra.mxu0 %v53_v13  ;;  %303 = vmatpush3.msra.mxu1 %v53_v13 }
  0x39   :  { %258 = vmatprep.subr.mxu0 %v52_v14  ;;  %288 = vmatprep.subr.mxu1 %v52_v14 }
  0x3a   :  { %259 = vmatpush3.msra.mxu0 %v52_v14  ;;  %304 = vmatpush3.msra.mxu1 %v52_v14 }
  0x3b   :  { %260 = vmatprep.subr.mxu0 %v51_v15  ;;  %289 = vmatprep.subr.mxu1 %v51_v15 }
  0x3c   :  { %261 = vmatpush3.msra.mxu0 %v51_v15  ;;  %305 = vmatpush3.msra.mxu1 %v51_v15 }
  0x3d   :  { %262 = vmatprep.mubr.f32.mxu0 %v43_v16  ;;  %268 = vmatprep.mubr.f32.mxu1 %v47_v17 }
  0x3e   :  { %263 = vmatmul.mubr.f32.vlgmr.msra.gmra.mxu0 %v44_v18  ;;  %269 = vmatmul.mubr.f32.vlgmr.msra.gmra.mxu1 %v48_v19 }
  0x3f   :  { %265 = vmatprep.mubr.f32.mxu0 %v45_v20  ;;  %271 = vmatprep.mubr.f32.mxu1 %v49_v21 }
  0x42   :  { %266 = vmatmul.mubr.f32.gmra.mxu0 %v46_v22  ;;  %272 = vmatmul.mubr.f32.gmra.mxu1 %v50_v23 }
  0xfe   :  { %v264_v25 = vpop.f32.mrf.mxu0  ;;  %v270_v26 = vpop.f32.mrf.mxu1 }
  0xff   :  { %v146_v27 = vadd.f32 %v264_v25, %v205_v24  ;;  %v166_v28 = vadd.f32 %v270_v26, %v205_v24 }
 0x100   :  { %v140_v29 = vpop.f32.mrf.mxu0  ;;  %v160_v30 = vpop.f32.mrf.mxu1 }
 0x101   :  { %180 = vst [vmem:[#allocation7 + $0x8] sm:$0xff] %v146_v27  ;;  %184 = vst [vmem:[#allocation7 + $0x28] sm:$0xff] %v166_v28  ;;  %v141_v31 = vadd.f32 %v205_v24, %v140_v29  ;;  %v161_v32 = vadd.f32 %v205_v24, %v160_v30 }
 0x102   :  { %v267_v33 = vpop.f32.mrf.mxu0  ;;  %v273_v34 = vpop.f32.mrf.mxu1 }
 0x103   :  { %179 = vst [vmem:[#allocation7] sm:$0xff] %v141_v31  ;;  %183 = vst [vmem:[#allocation7 + $0x20] sm:$0xff] %v161_v32  ;;  %v156_v35 = vadd.f32 %v267_v33, %v205_v24  ;;  %v176_v36 = vadd.f32 %v273_v34, %v205_v24 }
 0x104   :  { %v150_v37 = vpop.f32.mrf.mxu0  ;;  %v170_v38 = vpop.f32.mrf.mxu1 }
 0x105   :  { %182 = vst [vmem:[#allocation7 + $0x18] sm:$0xff] %v156_v35  ;;  %186 = vst [vmem:[#allocation7 + $0x38] sm:$0xff] %v176_v36  ;;  %v151_v39 = vadd.f32 %v205_v24, %v150_v37  ;;  %v171_v40 = vadd.f32 %v205_v24, %v170_v38 }
 0x107   :  { %181 = vst [vmem:[#allocation7 + $0x10] sm:$0xff] %v151_v39  ;;  %185 = vst [vmem:[#allocation7 + $0x30] sm:$0xff] %v171_v40 }
 0x108   :  { %362 = shalt.err (!%p359_p0)
}
 0x109   :  { %198 = dma.vmem_to_hbm [thread:$0]  %s193_s25, 1024, %s426_s3, [#allocation4], %s378_s15, %s378_s15, %s379_s16  }
 0x10a   :  { %375 = dma.done.wait [#allocation4], 1024  }
 0x10b   :  { %376 = vsyncadd [#allocation4], 4294966272 }
 0x10c   :  { %202 = vsyncpa [#allocation3], 1 }
 0x10d   :  { %203 = vsyncpa [#allocation6], 1 }
 0x10e   :  { %204 = vsyncpa [#allocation4], 1 }

</bundles_post_ra>
